<compile_context>
chip_gen: v7x
topology: tpu7x:2x2x1
jax: 0.10.0
libtpu: 0.0.40
codegen_flags: <defaults>
</compile_context>

<pallas_src>
import jax
import jax.numpy as jnp
from jax.experimental import pallas as pl
from jax.experimental.pallas import tpu as pltpu


def _round_up(x: int, m: int) -> int:
    return ((x + m - 1) // m) * m


# ----------------------------- kernels --------------------------------------

def _resident_kernel(x_ref, w_ref, b_ref, o_ref):
    # x_ref: (tm, K) input dtype | w_ref: (K, E_pad) bf16 (resident) | b_ref: (1, E_pad) f32
    x = x_ref[...].astype(jnp.bfloat16)          # in-register cast, no extra HBM pass
    acc = jnp.dot(x, w_ref[...], preferred_element_type=jnp.float32)
    o_ref[...] = (acc + b_ref[...]).astype(o_ref.dtype)


def _ktiled_kernel(x_ref, w_ref, b_ref, o_ref, acc_ref):
    # Fallback for weights too large to keep resident.
    k = pl.program_id(1)

    @pl.when(k == 0)
    def _():
        acc_ref[...] = jnp.zeros_like(acc_ref)

    acc_ref[...] += jnp.dot(x_ref[...].astype(jnp.bfloat16), w_ref[...],
                            preferred_element_type=jnp.float32)

    @pl.when(k == pl.num_programs(1) - 1)
    def _():
        o_ref[...] = (acc_ref[...] + b_ref[...]).astype(o_ref.dtype)


# ----------------------------- wrapper ---------------------------------------

def patch_embed_forward(x, conv_w, conv_b, patch_size, out_dtype=None):
    """x: (B, L, C) with C == embed_dim. conv_w: (E, C, P, 1). conv_b: (E,)."""
    B, L, C = x.shape
    E = conv_w.shape[0]
    P = patch_size
    Lp = L // P                                   # Conv2d floor behavior
    if Lp == 0:
        raise ValueError("L must be >= patch_size")
    if L != Lp * P:
        x = x[:, :Lp * P, :]                      # drop trailing remainder like Conv2d
    out_dtype = x.dtype if out_dtype is None else out_dtype

    # --- fold the (P,1)/stride-P conv into a GEMM (cheap param-side glue) -----
    x2d = x.reshape(B * Lp, P * C)                # contiguous reshape, no copy
    w_mat = jnp.transpose(conv_w[..., 0], (2, 1, 0)).reshape(P * C, E)   # (P*C, E)

    M, K = x2d.shape
    E_pad = _round_up(E, 128)                     # lane-dense output stores
    x_itemsize = jnp.dtype(x.dtype).itemsize
    out_itemsize = jnp.dtype(out_dtype).itemsize

    # bias (tiny): f32, padded
    b_p = jnp.zeros((1, E_pad), jnp.float32).at[0, :E].set(conv_b.astype(jnp.float32))

    # --- M tile: >= 2 tiles whenever possible (feed both v7x TensorCores) ------
    if M >= 1024:
        tm = 512
    elif M >= 32:
        tm = min(512, _round_up(pl.cdiv(M, 2), 16))
    else:
        tm = _round_up(M, 8)
    num_m = pl.cdiv(M, tm)

    # --- choose resident-weight path if the full weight fits in VMEM -----------
    resident_bytes = (2 * tm * K * x_itemsize            # x blocks (double-buffered)
                      + 2 * K * E_pad * 2                # weight (conservative 2 bufs)
                      + 2 * E_pad * 4                    # bias
                      + 2 * tm * E_pad * out_itemsize)   # output blocks
    RESIDENT_LIMIT = 40 * 1024 * 1024                    # headroom on v7x 64 MiB/TC

    if resident_bytes <= RESIDENT_LIMIT:
        # Fast path: whole weight resident, no K grid axis, no accumulator.
        w_p = jnp.zeros((K, E_pad), jnp.bfloat16).at[:, :E].set(
            w_mat.astype(jnp.bfloat16))
        kernel = _resident_kernel
        grid = (num_m,)
        in_specs = [
            pl.BlockSpec((tm, K), lambda i: (i, 0)),        # x streamed over M
            pl.BlockSpec((K, E_pad), lambda i: (0, 0)),     # weight resident
            pl.BlockSpec((1, E_pad), lambda i: (0, 0)),     # bias resident
        ]
        out_specs = pl.BlockSpec((tm, E_pad), lambda i: (i, 0))
        scratch_shapes = []
        dim_sem = ("parallel",)
        x_in = x2d
        vmem_est = resident_bytes
        x_bytes = M * K * x_itemsize
        w_bytes = K * E_pad * 2                             # weight read exactly once
        flops = 2 * M * K * E_pad
    else:
        # Fallback: K-tiled reduction. Pad K minimally to a multiple of 128 and pick
        # tk as a divisor of K_pad (no wasted zero columns beyond the <128 remainder).
        K_pad = _round_up(K, 128)
        tk = 128
        for cand in (512, 384, 256, 128):
            if K_pad % cand == 0:
                tk = cand
                break
        x_in = x2d if K_pad == K else jnp.pad(x2d, ((0, 0), (0, K_pad - K)))
        w_p = jnp.zeros((K_pad, E_pad), jnp.bfloat16).at[:K, :E].set(
            w_mat.astype(jnp.bfloat16))
        kernel = _ktiled_kernel
        grid = (num_m, K_pad // tk)
        in_specs = [
            pl.BlockSpec((tm, tk), lambda i, k: (i, k)),
            pl.BlockSpec((tk, E_pad), lambda i, k: (k, 0)),
            pl.BlockSpec((1, E_pad), lambda i, k: (0, 0)),
        ]
        out_specs = pl.BlockSpec((tm, E_pad), lambda i, k: (i, 0))
        scratch_shapes = [pltpu.VMEM((tm, E_pad), jnp.float32)]
        dim_sem = ("parallel", "arbitrary")
        vmem_est = (2 * tm * tk * x_itemsize + 2 * tk * E_pad * 2 + 2 * E_pad * 4
                    + 2 * tm * E_pad * out_itemsize + tm * E_pad * 4)
        x_bytes = M * K_pad * x_itemsize
        w_bytes = num_m * K_pad * E_pad * 2                 # weight re-read per M tile
        flops = 2 * M * K_pad * E_pad

    vmem_limit = int(min(max(2 * vmem_est, 32 * 1024 * 1024), 56 * 1024 * 1024))

    cost = pl.CostEstimate(
        flops=flops,
        transcendentals=0,
        bytes_accessed=x_bytes + w_bytes + E_pad * 4 + M * E_pad * out_itemsize,
    )

    out_p = pl.pallas_call(
        kernel,
        out_shape=jax.ShapeDtypeStruct((M, E_pad), out_dtype),
        grid_spec=pltpu.PrefetchScalarGridSpec(
            num_scalar_prefetch=0,
            grid=grid,
            in_specs=in_specs,
            out_specs=out_specs,
            scratch_shapes=scratch_shapes,
        ),
        compiler_params=pltpu.CompilerParams(
            dimension_semantics=dim_sem,
            vmem_limit_bytes=vmem_limit,
        ),
        cost_estimate=cost,
    )(x_in, w_p, b_p)

    return out_p[:, :E].reshape(B, Lp, E)


# ----------------------------- demo / check ----------------------------------

if __name__ == "__main__":
    # Module hyperparameters (small, consistent with the forward pass).
    patch_size = 4
    in_channels = 4          # module arg; the Conv2d actually maps embed_dim -> embed_dim
    embed_dim = 32

    B, L, C = 2, 16, embed_dim   # forward requires C == embed_dim

    key = jax.random.PRNGKey(0)
    kx, kw, kb = jax.random.split(key, 3)

    x = jax.random.normal(kx, (B, L, C), dtype=jnp.float32)
    # Deterministic synthetic Conv2d params: weight (E, E, P, 1), bias (E,)
    fan_in = embed_dim * patch_size * 1
    bound = 1.0 / (fan_in ** 0.5)
    conv_w = jax.random.uniform(kw, (embed_dim, embed_dim, patch_size, 1),
                                minval=-bound, maxval=bound, dtype=jnp.float32)
    conv_b = jax.random.uniform(kb, (embed_dim,),
                                minval=-bound, maxval=bound, dtype=jnp.float32)

    out = patch_embed_forward(x, conv_w, conv_b, patch_size)
    out = jax.block_until_ready(out)

    # Pure-JAX references (same math as the PyTorch Conv2d path).
    Lp = L // patch_size
    x_patches = x.reshape(B, Lp, patch_size, C)
    ref_bf16 = jnp.einsum("bpkc,eck->bpe",
                          x_patches.astype(jnp.bfloat16),
                          conv_w[..., 0].astype(jnp.bfloat16),
                          preferred_element_type=jnp.float32) + conv_b
    ref_f32 = jnp.einsum("bpkc,eck->bpe", x_patches, conv_w[..., 0]) + conv_b

    assert out.shape == (B, Lp, embed_dim)
    # Matches the bf16-input / f32-accumulate math closely...
    assert jnp.allclose(out, ref_bf16, atol=1e-3, rtol=1e-3)
    # ...and stays near the full-f32 reference (bf16 quantization of x/W only).
    assert jnp.allclose(out, ref_f32, atol=5e-2, rtol=5e-2)

    print("KERNEL_OK")
</pallas_src>

<mosaic_0001>
module attributes {stable_mosaic.version = 11 : i64} {
  func.func @_resident_kernel(%arg0: i32, %arg1: memref<8x128xf32, #tpu.memory_space<vmem>>, %arg2: memref<128x128xbf16, #tpu.memory_space<vmem>>, %arg3: memref<1x128xf32, #tpu.memory_space<vmem>>, %arg4: memref<8x128xf32, #tpu.memory_space<vmem>>) attributes {dimension_semantics = [#tpu.dimension_semantics<parallel>], iteration_bounds = array<i64: 1>, scalar_prefetch = 0 : i64, scratch_operands = 0 : i64, tpu.core_type = #tpu.core_type<tc>, window_params = [{transform_indices = @transform_0, window_bounds = array<i64: 8, 128>}, {pipeline_mode = #tpu.pipeline_mode<synchronous>, transform_indices = @transform_1, window_bounds = array<i64: 128, 128>}, {pipeline_mode = #tpu.pipeline_mode<synchronous>, transform_indices = @transform_2, window_bounds = array<i64: 1, 128>}, {transform_indices = @transform_3, window_bounds = array<i64: 8, 128>}]} {
    %c0 = arith.constant 0 : index
    %c0_0 = arith.constant 0 : index
    %0 = vector.load %arg1[%c0, %c0_0] : memref<8x128xf32, #tpu.memory_space<vmem>>, vector<8x128xf32>
    %1 = arith.truncf %0 : vector<8x128xf32> to vector<8x128xbf16>
    %c0_1 = arith.constant 0 : index
    %c0_2 = arith.constant 0 : index
    %2 = vector.load %arg2[%c0_1, %c0_2] : memref<128x128xbf16, #tpu.memory_space<vmem>>, vector<128x128xbf16>
    %cst = arith.constant dense<0.000000e+00> : vector<8x128xf32>
    %3 = tpu.matmul %1, %2, %cst {dimension_numbers = #tpu.dot_dimension_numbers<[1], [0], [0], [1], [0, 0, 1, 1], [], []>} : vector<8x128xbf16>, vector<128x128xbf16>, vector<8x128xf32> -> vector<8x128xf32>
    %c0_3 = arith.constant 0 : index
    %c0_4 = arith.constant 0 : index
    %4 = vector.load %arg3[%c0_3, %c0_4] : memref<1x128xf32, #tpu.memory_space<vmem>>, vector<1x128xf32>
    %5 = vector.broadcast %4 : vector<1x128xf32> to vector<8x128xf32>
    %6 = arith.addf %3, %5 : vector<8x128xf32>
    %c0_5 = arith.constant 0 : index
    %c0_6 = arith.constant 0 : index
    %7 = vector.load %arg4[%c0_5, %c0_6] : memref<8x128xf32, #tpu.memory_space<vmem>>, vector<8x128xf32>
    tpu.vector_store %arg4[%c0_5, %c0_6], %6 {strides = array<i32>} : memref<8x128xf32, #tpu.memory_space<vmem>>, vector<8x128xf32>,
    return
  }
  func.func @transform_0(%arg0: i32) -> (i32, i32) {
    %c0_i32 = arith.constant 0 : i32
    %c0_i32_0 = arith.constant 0 : i32
    return %arg0, %c0_i32 : i32, i32
  }
  func.func @transform_1(%arg0: i32) -> (i32, i32) {
    %c0_i32 = arith.constant 0 : i32
    %c0_i32_0 = arith.constant 0 : i32
    %c0_i32_1 = arith.constant 0 : i32
    return %c0_i32, %c0_i32_0 : i32, i32
  }
  func.func @transform_2(%arg0: i32) -> (i32, i32) {
    %c0_i32 = arith.constant 0 : i32
    %c0_i32_0 = arith.constant 0 : i32
    %c0_i32_1 = arith.constant 0 : i32
    return %c0_i32, %c0_i32_0 : i32, i32
  }
  func.func @transform_3(%arg0: i32) -> (i32, i32) {
    %c0_i32 = arith.constant 0 : i32
    %c0_i32_0 = arith.constant 0 : i32
    return %arg0, %c0_i32 : i32, i32
  }
}

</mosaic_0001>

<bundles_post_ra>
// kernel: tpu_custom_call.1
= control target key start
LH: loop header
LB: loop body
LE: loop exit
PB: predicated region body
PF: predicated region fallthrough
CT: control target
= control target key end

     0   :  { %8 = vsyncpa [#allocation3], 0  ;;  %s370_s0 = inlined_call_operand.hbm [shape: f32[8,128], index: 0, kind: input, shape index: {}]   ;;  %s371_s1 = inlined_call_operand.hbm [shape: bf16[128,128], index: 1, kind: input, shape index: {}]   ;;  %s372_s2 = inlined_call_operand.vmem [shape: f32[1,128], index: 2, kind: input, shape index: {}]   ;;  %s373_s3 = inlined_call_operand.hbm [shape: f32[8,128], index: 3, kind: output, shape index: {}]  }
   0x1   :  { %9 = vsyncpa [#allocation6], 0 }
   0x2   :  { %10 = vsyncpa [#allocation4], 0  ;;  %s297_s12 = smov [#allocation2]   ;;  %s298_s14 = smov [#allocation5]  }
   0x3   :  { %s17_s13 = sshll.u32 %s297_s12, 4  ;;  %s26_s15 = sshll.u32 %s298_s14, 4  ;;  %s18_s13 = int_to_ptr.vmem [resolvable:$true] %s17_s13  ;;  %s324_s15 = int_to_ptr.vmem [resolvable:$true] %s26_s15 }
   0x4   :  { %s225_s18 = scalar_lea.hbm %s370_s0, 128 }
   0x5   :  { %p226_p0 = scmp.ne.s32.totalorder %s370_s0, %s225_s18  ;;  %p229_p1 = scmp.lt.u32.totalorder %s225_s18, %s370_s0 }
   0x7   :  { %p231_p2 = pnand %p229_p1, %p226_p0 }
   0x9   :  { %234 = shalt.err (!%p231_p2)
}
   0xa   :  { %s235_s23 = scalar_lea.vmem %s18_s13, 128  ;;  %p240_p4 = scmp.lt.s32.totalorder %s18_s13, %s18_s13 }
   0xb   :  { %p236_p3 = scmp.ne.s32.totalorder %s18_s13, %s235_s23  ;;  %p241_p5 = scmp.lt.s32.totalorder %s235_s23, %s235_s23 }
   0xd   :  { %p242_p6 = por %p241_p5, %p240_p4 }
   0xf   :  { %p243_p7 = pnand %p242_p6, %p236_p3 }
  0x11   :  { %246 = shalt.err (!%p243_p7)
}
  0x12   :  { %20 = dma.hbm_to_vmem [thread:$0]  %s370_s0, 128, %s18_s13, [#allocation3]  }
  0x13   :  { %s247_s28 = scalar_lea.hbm %s371_s1, 1024 }
  0x14   :  { %p248_p8 = scmp.ne.s32.totalorder %s371_s1, %s247_s28  ;;  %p251_p9 = scmp.lt.u32.totalorder %s247_s28, %s371_s1 }
  0x16   :  { %p253_p10 = pnand %p251_p9, %p248_p8 }
  0x18   :  { %256 = shalt.err (!%p253_p10)
}
  0x19   :  { %s257_s6 = scalar_lea.vmem %s324_s15, 1024  ;;  %p262_p12 = scmp.lt.s32.totalorder %s324_s15, %s324_s15 }
  0x1a   :  { %p258_p11 = scmp.ne.s32.totalorder %s324_s15, %s257_s6  ;;  %p263_p13 = scmp.lt.s32.totalorder %s257_s6, %s257_s6 }
  0x1c   :  { %p264_p0 = por %p263_p13, %p262_p12 }
  0x1e   :  { %p265_p1 = pnand %p264_p0, %p258_p11 }
  0x20   :  { %268 = shalt.err (!%p265_p1)
}
  0x21   :  { %s299_s0 = smov 64   ;;  %s300_s7 = smov 4  }
  0x22   :  { %32 = dma.hbm_to_vmem [thread:$0]  %s371_s1, 1024, %s324_s15, [#allocation6], %s299_s0, %s299_s0, %s300_s7  }
  0x23   :  { %291 = dma.done.wait [#allocation3], 128  }
  0x24   :  { %292 = vsyncadd [#allocation3], 4294967168 }
  0x25   :  { %293 = dma.done.wait [#allocation6], 1024  }
  0x26   :  { %294 = vsyncadd [#allocation6], 4294966272  ;;  %v301_v0 = vmov 0.0   ;;  %vm302_vm0 = vmmov 0   ;;  %v217_v1 = vld [vmem:[#allocation5] sm:$0xff]   ;;  %v218_v2 = vld [vmem:[#allocation5 + $0x8] sm:$0xff]  }
  0x27   :  { %190 = vmatprep.subr.bf16.mxu0 %v301_v0  ;;  %206 = vmatprep.mubr.msk.bf16.mxu0 %vm302_vm0, %v301_v0  ;;  %v219_v3 = vld [vmem:[#allocation5 + $0x10] sm:$0xff]   ;;  %v220_v4 = vld [vmem:[#allocation5 + $0x18] sm:$0xff]   ;;  %v221_v5 = vld [vmem:[#allocation5 + $0x20] sm:$0xff]   ;;  %s303_s11 = smov [#allocation7]  }
  0x28   :  { %191 = vmatpush3.bf16.msra.mxu0 %v217_v1  ;;  %v222_v6 = vld [vmem:[#allocation5 + $0x28] sm:$0xff]   ;;  %v223_v7 = vld [vmem:[#allocation5 + $0x30] sm:$0xff]   ;;  %v224_v8 = vld [vmem:[#allocation5 + $0x38] sm:$0xff]   ;;  %s162_s12 = sshll.u32 %s303_s11, 4  ;;  %s163_s12 = int_to_ptr.vmem [resolvable:$true] %s162_s12 }
  0x29   :  { %192 = vmatprep.subr.bf16.mxu0 %v301_v0  ;;  %v42_v9 = vld [vmem:[#allocation2] sm:$0xff]  ;;  %s269_s13 = scalar_lea.vmem %s163_s12, 128  ;;  %p274_p3 = scmp.lt.s32.totalorder %s163_s12, %s163_s12 }
  0x2a   :  { %v43_v10 = vpack.c.bf16 %v42_v9, %v42_v9  ;;  %v172_v11 = vld [vmem:[%s372_s2] ss:$0 sm:$0xff]  ;;  %p270_p2 = scmp.ne.s32.totalorder %s163_s12, %s269_s13  ;;  %p275_p4 = scmp.lt.s32.totalorder %s269_s13, %s269_s13 }
  0x2c   :  { %193 = vmatpush3.bf16.msra.mxu0 %v218_v2  ;;  %p276_p5 = por %p275_p4, %p274_p3 }
  0x2d   :  { %194 = vmatprep.subr.bf16.mxu0 %v301_v0 }
  0x2e   :  { %p277_p6 = pnand %p276_p5, %p270_p2 }
  0x30   :  { %195 = vmatpush3.bf16.msra.mxu0 %v219_v3 }
  0x31   :  { %196 = vmatprep.subr.bf16.mxu0 %v301_v0 }
  0x34   :  { %197 = vmatpush3.bf16.msra.mxu0 %v220_v4 }
  0x35   :  { %198 = vmatprep.subr.bf16.mxu0 %v301_v0 }
  0x38   :  { %199 = vmatpush3.bf16.msra.mxu0 %v221_v5 }
  0x39   :  { %200 = vmatprep.subr.bf16.mxu0 %v301_v0 }
  0x3c   :  { %201 = vmatpush3.bf16.msra.mxu0 %v222_v6 }
  0x3d   :  { %202 = vmatprep.subr.bf16.mxu0 %v301_v0 }
  0x40   :  { %203 = vmatpush3.bf16.msra.mxu0 %v223_v7 }
  0x41   :  { %204 = vmatprep.subr.bf16.mxu0 %v301_v0 }
  0x44   :  { %205 = vmatpush3.bf16.msra.mxu0 %v224_v8 }
  0x47   :  { %207 = vmatmul.mubr.bf16.vlgmr.msra.gmra.mrb[0].mxu0 %v43_v10 }
 0x11a   :  { %v149_v12 = vpop.f32.mrb[0].mxu0 }
 0x11b   :  { %v150_v13 = vadd.f32 %v172_v11, %v149_v12  ;;  %v208_v14 = vpop.f32.mrb[1].mxu0 }
 0x11c   :  { %v152_v15 = vpop.f32.mrb[2].mxu0 }
 0x11d   :  { %155 = vst [vmem:[#allocation7] sm:$0xff] %v150_v13  ;;  %v209_v16 = vpop.f32.mrb[3].mxu0 }
 0x11e   :  { %280 = shalt.err (!%p277_p6)
}
 0x11f   :  { %s281_s2 = scalar_lea.hbm %s373_s3, 128 }
 0x120   :  { %p282_p7 = scmp.ne.s32.totalorder %s373_s3, %s281_s2  ;;  %p285_p8 = scmp.lt.u32.totalorder %s281_s2, %s373_s3 }
 0x122   :  { %p287_p9 = pnand %p285_p8, %p282_p7 }
 0x124   :  { %290 = shalt.err (!%p287_p9)
}
 0x125   :  { %165 = dma.vmem_to_hbm [thread:$0]  %s163_s12, 128, %s373_s3, [#allocation4]  }
 0x126   :  { %295 = dma.done.wait [#allocation4], 128  }
 0x127   :  { %296 = vsyncadd [#allocation4], 4294967168 }
 0x128   :  { %169 = vsyncpa [#allocation3], 1 }
 0x129   :  { %170 = vsyncpa [#allocation6], 1 }
 0x12a   :  { %171 = vsyncpa [#allocation4], 1 }

</bundles_post_ra>
